<compile_context>
chip_gen: v6e
topology: v6e:2x2x1
jax: 0.10.0
libtpu: 0.0.40
codegen_flags: <defaults>
</compile_context>

<pallas_src>
import jax
import jax.numpy as jnp
from jax import lax
from jax.experimental import pallas as pl
from jax.experimental.pallas import tpu as pltpu


def _round_up(x, m):
    return ((x + m - 1) // m) * m


def _vrnn_kernel(u_ref, h0_ref, wih_ref, whh_ref, b_ref, wout_ref, bout_ref,
                 y_ref, s_ref, h_scr):
    """One time-chunk: batched input projection, serial relu recurrence, batched readout."""
    Tt, Bp, NU = u_ref.shape
    NX = whh_ref.shape[0]
    NY = wout_ref.shape[1]
    cdt = whh_ref.dtype  # compute dtype fed to the MXU (f32 or bf16)

    # Hidden-state carry lives in a persistent VMEM scratch across grid steps.
    @pl.when(pl.program_id(0) == 0)
    def _():
        h_scr[...] = h0_ref[...]

    # ---- Phase 1 (off the serial chain): input projection for the whole chunk as one MXU
    #      matmul, bias (b_ih + b_hh) folded in, written straight into the states block.
    g = jnp.dot(u_ref[...].reshape(Tt * Bp, NU), wih_ref[...],
                preferred_element_type=jnp.float32) + b_ref[...]
    s_ref[...] = g.reshape(Tt, Bp, NX)

    # ---- Phase 2 (serial): recurrence over the chunk. s_ref[t] holds g[t] on entry and is
    #      overwritten in place with the state h[t] (no separate g scratch).
    whh = whh_ref[...]  # NX=128 -> 16 vregs f32 (8 in bf16); stays resident across the loop.
    # TODO(synk): for NX >= 256 pin W_hh in the MXU weight registers instead
    # (pltpu.matmul_push_rhs once + matmul_acc_lhs/matmul_pop per step) so the serial step
    # does not re-push the same RHS every iteration and whh does not spill vregs.

    def step(t, h):
        h_new = jnp.maximum(
            s_ref[t] + jnp.dot(h.astype(cdt), whh,
                               preferred_element_type=jnp.float32),
            0.0)
        s_ref[t] = h_new
        return h_new

    h_last = lax.fori_loop(0, Tt, step, h_scr[...], unroll=8)
    h_scr[...] = h_last

    # ---- Phase 3 (off the serial chain): readout for the whole chunk as one MXU matmul.
    #      NY is the true ny (full-dim block), so no 128-lane-padded writeback.
    y = jnp.dot(s_ref[...].reshape(Tt * Bp, NX).astype(cdt), wout_ref[...],
                preferred_element_type=jnp.float32) + bout_ref[...]
    y_ref[...] = y.reshape(Tt, Bp, NY)


def vrnn_forward(u, h0, w_ih, w_hh, b_ih, b_hh, w_out, b_out, *,
                 compute_dtype=jnp.float32, time_tile=128):
    """u: (B, T, nu) batch_first; h0: (1, batches, nx). Returns (y, states) like vRNN.forward."""
    B, T, nu = u.shape
    nx = w_hh.shape[0]
    ny = w_out.shape[0]
    f32 = jnp.float32
    cdt = jnp.dtype(compute_dtype)

    # Hardware quanta: batch -> 8 sublanes, hidden -> 128 lanes. nu / ny stay un-padded
    # (full-dim blocks are legal and avoid 32x / 42x inflation of the u read / y write).
    Bp = _round_up(B, 8)
    NX = _round_up(nx, 128)
    Tt = min(_round_up(T, 8), _round_up(time_tile, 8))  # time chunk, multiple of 8 sublanes
    Tp = _round_up(T, Tt)
    nT = Tp // Tt

    # Glue: time-major + zero-pad (batch / time / hidden only). Zero padding is exact:
    # padded hidden lanes of g, h0, W_hh and biases are 0, stay 0 through relu, never leak.
    # TODO(synk): fold the batch-first<->time-major transposes into the kernel
    # (batch-first blocks + dynamic sublane indexing) to drop these wrapper HBM passes.
    u_p = jnp.zeros((Tp, Bp, nu), cdt).at[:T, :B, :].set(
        jnp.transpose(u, (1, 0, 2)).astype(cdt))
    h0_p = jnp.zeros((Bp, NX), f32).at[:B, :nx].set(h0[0, :B, :].astype(f32))
    wih_p = jnp.zeros((nu, NX), cdt).at[:, :nx].set(jnp.transpose(w_ih).astype(cdt))
    whh_p = jnp.zeros((NX, NX), cdt).at[:nx, :nx].set(jnp.transpose(w_hh).astype(cdt))
    b_p = jnp.zeros((1, NX), f32).at[0, :nx].set((b_ih + b_hh).astype(f32))
    wout_p = jnp.zeros((NX, ny), cdt).at[:nx, :].set(jnp.transpose(w_out).astype(cdt))
    bout_p = b_out.astype(f32).reshape(1, ny)

    # VMEM budget: actual per-chunk footprint (double-buffered) with 2x margin, capped at
    # 48 MiB so v7x (64 MiB physical / TC) keeps headroom; v5e/v6e (128 MiB) trivially fit.
    csz = cdt.itemsize
    chunk_bytes = (2 * Tt * Bp * nu * csz                       # u block (double-buffered)
                   + 2 * Tt * Bp * NX * 4                       # states block
                   + 2 * Tt * Bp * ny * 4                       # y block
                   + 2 * (nu * NX + NX * NX + NX * ny) * csz    # weights
                   + 2 * (NX + ny + Bp * NX) * 4                # biases + h0
                   + Bp * NX * 4)                               # persistent h scratch
    vmem_limit = int(min(48 * 1024 * 1024, max(16 * 1024 * 1024, 2 * chunk_bytes)))

    # TODO(synk): on v7x add a leading "parallel" grid axis over independent batch tiles so
    # both TensorCores run their own recurrence chain.
    y_p, s_p = pl.pallas_call(
        _vrnn_kernel,
        out_shape=(jax.ShapeDtypeStruct((Tp, Bp, ny), f32),
                   jax.ShapeDtypeStruct((Tp, Bp, NX), f32)),
        grid_spec=pltpu.PrefetchScalarGridSpec(
            num_scalar_prefetch=0,
            grid=(nT,),  # sequential time chunks; h carried in VMEM scratch
            in_specs=[
                pl.BlockSpec((Tt, Bp, nu), lambda i: (i, 0, 0)),   # u chunk (time-major)
                pl.BlockSpec((Bp, NX), lambda i: (0, 0)),          # h0
                pl.BlockSpec((nu, NX), lambda i: (0, 0)),          # W_ih^T
                pl.BlockSpec((NX, NX), lambda i: (0, 0)),          # W_hh^T
                pl.BlockSpec((1, NX), lambda i: (0, 0)),           # b_ih + b_hh
                pl.BlockSpec((NX, ny), lambda i: (0, 0)),          # W_out^T
                pl.BlockSpec((1, ny), lambda i: (0, 0)),           # b_out
            ],
            out_specs=(
                pl.BlockSpec((Tt, Bp, ny), lambda i: (i, 0, 0)),   # y chunk (true ny lanes)
                pl.BlockSpec((Tt, Bp, NX), lambda i: (i, 0, 0)),   # states chunk
            ),
            scratch_shapes=[pltpu.VMEM((Bp, NX), f32)],            # persistent hidden state
        ),
        compiler_params=pltpu.CompilerParams(
            dimension_semantics=("arbitrary",),   # chunks carry h -> strictly sequential
            vmem_limit_bytes=vmem_limit),
    )(u_p, h0_p, wih_p, whh_p, b_p, wout_p, bout_p)

    # Slice padding away, restore batch-first layout (PyTorch module returns batch_first).
    y = jnp.transpose(y_p[:T, :B, :], (1, 0, 2))         # (B, T, ny)
    states = jnp.transpose(s_p[:T, :B, :nx], (1, 0, 2))  # (B, T, nx)
    return y, states


def _reference_forward(u, h0, w_ih, w_hh, b_ih, b_hh, w_out, b_out):
    """Plain-JAX reference of torch.nn.RNN(relu, batch_first) + Linear."""
    B, T, _ = u.shape
    h = h0[0, :B, :]
    states = []
    for t in range(T):
        h = jnp.maximum(u[:, t, :] @ w_ih.T + b_ih + h @ w_hh.T + b_hh, 0.0)
        states.append(h)
    states = jnp.stack(states, axis=1)
    y = states @ w_out.T + b_out
    return y, states


if __name__ == "__main__":
    # Module hyper-parameters implied by vRNN.__init__
    B, T = 2, 8            # batches, sequence length
    nu, nx, ny = 4, 32, 3  # input_size, hidden_size, output_size

    key = jax.random.PRNGKey(0)
    ks = jax.random.split(key, 8)
    bound = 1.0 / jnp.sqrt(nx)

    # Parameters (deterministic synthetic init, PyTorch shape conventions)
    w_ih_raw = jax.random.uniform(ks[0], (nx, nu), minval=-bound, maxval=bound)
    # Replicate: U, S, V = weight_ih_l0.svd(); weight_ih_l0 = U @ V.T  (semi-orthogonal)
    U, _, Vh = jnp.linalg.svd(w_ih_raw, full_matrices=False)
    w_ih = U @ Vh                                                        # (nx, nu)
    w_hh = jax.random.uniform(ks[1], (nx, nx), minval=-bound, maxval=bound)
    b_ih = jax.random.uniform(ks[2], (nx,), minval=-bound, maxval=bound)
    b_hh = jax.random.uniform(ks[3], (nx,), minval=-bound, maxval=bound)
    w_out = jax.random.uniform(ks[4], (ny, nx), minval=-bound, maxval=bound)
    b_out = jax.random.uniform(ks[5], (ny,), minval=-bound, maxval=bound)
    h0 = jax.random.uniform(ks[6], (1, B, nx))                           # learned init hidden

    # Input u: (B, T, nu), batch_first like the PyTorch module
    u = jax.random.normal(ks[7], (B, T, nu), dtype=jnp.float32)

    y_true, s_true = _reference_forward(u, h0, w_ih, w_hh, b_ih, b_hh, w_out, b_out)

    # f32 compute path: bit-tight check against the reference.
    y, states = vrnn_forward(u, h0, w_ih, w_hh, b_ih, b_hh, w_out, b_out)
    jax.block_until_ready((y, states))
    assert y.shape == (B, T, ny) and states.shape == (B, T, nx)
    assert jnp.allclose(y, y_true, atol=1e-4, rtol=1e-4)
    assert jnp.allclose(states, s_true, atol=1e-4, rtol=1e-4)

    # bf16 MXU path (v6e/v7x perf feedback): bf16 operands, f32 accumulation -> looser check.
    y16, s16 = vrnn_forward(u, h0, w_ih, w_hh, b_ih, b_hh, w_out, b_out,
                            compute_dtype=jnp.bfloat16)
    jax.block_until_ready((y16, s16))
    rel_y = jnp.linalg.norm(y16 - y_true) / (jnp.linalg.norm(y_true) + 1e-12)
    rel_s = jnp.linalg.norm(s16 - s_true) / (jnp.linalg.norm(s_true) + 1e-12)
    assert float(rel_y) < 5e-2 and float(rel_s) < 5e-2

    print("KERNEL_OK")
</pallas_src>

<mosaic_0001>
module attributes {stable_mosaic.version = 11 : i64} {
  func.func @_vrnn_kernel(%arg0: i32, %arg1: memref<8x8x4xf32, #tpu.memory_space<vmem>>, %arg2: memref<8x128xf32, #tpu.memory_space<vmem>>, %arg3: memref<4x128xf32, #tpu.memory_space<vmem>>, %arg4: memref<128x128xf32, #tpu.memory_space<vmem>>, %arg5: memref<1x128xf32, #tpu.memory_space<vmem>>, %arg6: memref<128x3xf32, #tpu.memory_space<vmem>>, %arg7: memref<1x3xf32, #tpu.memory_space<vmem>>, %arg8: memref<8x8x3xf32, #tpu.memory_space<vmem>>, %arg9: memref<8x8x128xf32, #tpu.memory_space<vmem>>, %arg10: memref<8x128xf32, #tpu.memory_space<vmem>>) attributes {dimension_semantics = [#tpu.dimension_semantics<arbitrary>], iteration_bounds = array<i64: 1>, scalar_prefetch = 0 : i64, scratch_operands = 1 : i64, tpu.core_type = #tpu.core_type<tc>, window_params = [{transform_indices = @transform_0, window_bounds = array<i64: 8, 8, 4>}, {pipeline_mode = #tpu.pipeline_mode<synchronous>, transform_indices = @transform_1, window_bounds = array<i64: 8, 128>}, {pipeline_mode = #tpu.pipeline_mode<synchronous>, transform_indices = @transform_2, window_bounds = array<i64: 4, 128>}, {pipeline_mode = #tpu.pipeline_mode<synchronous>, transform_indices = @transform_3, window_bounds = array<i64: 128, 128>}, {pipeline_mode = #tpu.pipeline_mode<synchronous>, transform_indices = @transform_4, window_bounds = array<i64: 1, 128>}, {pipeline_mode = #tpu.pipeline_mode<synchronous>, transform_indices = @transform_5, window_bounds = array<i64: 128, 3>}, {pipeline_mode = #tpu.pipeline_mode<synchronous>, transform_indices = @transform_6, window_bounds = array<i64: 1, 3>}, {transform_indices = @transform_7, window_bounds = array<i64: 8, 8, 3>}, {transform_indices = @transform_8, window_bounds = array<i64: 8, 8, 128>}]} {
    %c0_i32 = arith.constant 0 : i32
    %0 = arith.cmpi eq, %arg0, %c0_i32 : i32
    %1 = arith.extui %0 : i1 to i32
    %c0_i32_0 = arith.constant 0 : i32
    %2 = arith.cmpi ne, %1, %c0_i32_0 : i32
    scf.if %2 {
      %c0_76 = arith.constant 0 : index
      %c0_77 = arith.constant 0 : index
      %112 = vector.load %arg2[%c0_76, %c0_77] : memref<8x128xf32, #tpu.memory_space<vmem>>, vector<8x128xf32>
      %c0_78 = arith.constant 0 : index
      %c0_79 = arith.constant 0 : index
      %113 = vector.load %arg10[%c0_78, %c0_79] : memref<8x128xf32, #tpu.memory_space<vmem>>, vector<8x128xf32>
      tpu.vector_store %arg10[%c0_78, %c0_79], %112 {strides = array<i32>} : memref<8x128xf32, #tpu.memory_space<vmem>>, vector<8x128xf32>,
    } else {
    }
    %c0 = arith.constant 0 : index
    %c0_1 = arith.constant 0 : index
    %c0_2 = arith.constant 0 : index
    %3 = vector.load %arg1[%c0, %c0_1, %c0_2] : memref<8x8x4xf32, #tpu.memory_space<vmem>>, vector<8x8x4xf32>
    %4 = vector.shape_cast %3 : vector<8x8x4xf32> to vector<64x4xf32>
    %c0_3 = arith.constant 0 : index
    %c0_4 = arith.constant 0 : index
    %5 = vector.load %arg3[%c0_3, %c0_4] : memref<4x128xf32, #tpu.memory_space<vmem>>, vector<4x128xf32>
    %cst = arith.constant dense<0.000000e+00> : vector<64x128xf32>
    %6 = tpu.matmul %4, %5, %cst {dimension_numbers = #tpu.dot_dimension_numbers<[1], [0], [0], [1], [0, 0, 1, 1], [], []>} : vector<64x4xf32>, vector<4x128xf32>, vector<64x128xf32> -> vector<64x128xf32>
    %c0_5 = arith.constant 0 : index
    %c0_6 = arith.constant 0 : index
    %7 = vector.load %arg5[%c0_5, %c0_6] : memref<1x128xf32, #tpu.memory_space<vmem>>, vector<1x128xf32>
    %8 = vector.broadcast %7 : vector<1x128xf32> to vector<64x128xf32>
    %9 = arith.addf %6, %8 : vector<64x128xf32>
    %10 = vector.shape_cast %9 : vector<64x128xf32> to vector<8x8x128xf32>
    %c0_7 = arith.constant 0 : index
    %c0_8 = arith.constant 0 : index
    %c0_9 = arith.constant 0 : index
    %11 = vector.load %arg9[%c0_7, %c0_8, %c0_9] : memref<8x8x128xf32, #tpu.memory_space<vmem>>, vector<8x8x128xf32>
    tpu.vector_store %arg9[%c0_7, %c0_8, %c0_9], %10 {strides = array<i32>} : memref<8x8x128xf32, #tpu.memory_space<vmem>>, vector<8x8x128xf32>,
    %c0_10 = arith.constant 0 : index
    %c0_11 = arith.constant 0 : index
    %12 = vector.load %arg4[%c0_10, %c0_11] : memref<128x128xf32, #tpu.memory_space<vmem>>, vector<128x128xf32>
    %c0_12 = arith.constant 0 : index
    %c0_13 = arith.constant 0 : index
    %13 = vector.load %arg10[%c0_12, %c0_13] : memref<8x128xf32, #tpu.memory_space<vmem>>, vector<8x128xf32>
    %c0_i32_14 = arith.constant 0 : i32
    %14 = arith.index_cast %c0_i32_14 : i32 to index
    %c0_15 = arith.constant 0 : index
    %c0_16 = arith.constant 0 : index
    %15 = vector.load %arg9[%14, %c0_15, %c0_16] : memref<8x8x128xf32, #tpu.memory_space<vmem>>, vector<1x8x128xf32>
    %16 = vector.shape_cast %15 : vector<1x8x128xf32> to vector<8x128xf32>
    %cst_17 = arith.constant dense<0.000000e+00> : vector<8x128xf32>
    %17 = tpu.matmul %13, %12, %cst_17 {dimension_numbers = #tpu.dot_dimension_numbers<[1], [0], [0], [1], [0, 0, 1, 1], [], []>} : vector<8x128xf32>, vector<128x128xf32>, vector<8x128xf32> -> vector<8x128xf32>
    %18 = arith.addf %16, %17 : vector<8x128xf32>
    %cst_18 = arith.constant 0.000000e+00 : f32
    %19 = vector.broadcast %cst_18 : f32 to vector<8x128xf32>
    %20 = arith.maximumf %18, %19 : vector<8x128xf32>
    %21 = arith.index_cast %c0_i32_14 : i32 to index
    %c0_19 = arith.constant 0 : index
    %c0_20 = arith.constant 0 : index
    %22 = vector.load %arg9[%21, %c0_19, %c0_20] : memref<8x8x128xf32, #tpu.memory_space<vmem>>, vector<1x8x128xf32>
    %23 = vector.shape_cast %22 : vector<1x8x128xf32> to vector<8x128xf32>
    %24 = vector.shape_cast %20 : vector<8x128xf32> to vector<1x8x128xf32>
    tpu.vector_store %arg9[%21, %c0_19, %c0_20], %24 {strides = array<i32>} : memref<8x8x128xf32, #tpu.memory_space<vmem>>, vector<1x8x128xf32>,
    %c1_i32 = arith.constant 1 : i32
    %25 = arith.index_cast %c1_i32 : i32 to index
    %c0_21 = arith.constant 0 : index
    %c0_22 = arith.constant 0 : index
    %26 = vector.load %arg9[%25, %c0_21, %c0_22] : memref<8x8x128xf32, #tpu.memory_space<vmem>>, vector<1x8x128xf32>
    %27 = vector.shape_cast %26 : vector<1x8x128xf32> to vector<8x128xf32>
    %cst_23 = arith.constant dense<0.000000e+00> : vector<8x128xf32>
    %28 = tpu.matmul %20, %12, %cst_23 {dimension_numbers = #tpu.dot_dimension_numbers<[1], [0], [0], [1], [0, 0, 1, 1], [], []>} : vector<8x128xf32>, vector<128x128xf32>, vector<8x128xf32> -> vector<8x128xf32>
    %29 = arith.addf %27, %28 : vector<8x128xf32>
    %cst_24 = arith.constant 0.000000e+00 : f32
    %30 = vector.broadcast %cst_24 : f32 to vector<8x128xf32>
    %31 = arith.maximumf %29, %30 : vector<8x128xf32>
    %32 = arith.index_cast %c1_i32 : i32 to index
    %c0_25 = arith.constant 0 : index
    %c0_26 = arith.constant 0 : index
    %33 = vector.load %arg9[%32, %c0_25, %c0_26] : memref<8x8x128xf32, #tpu.memory_space<vmem>>, vector<1x8x128xf32>
    %34 = vector.shape_cast %33 : vector<1x8x128xf32> to vector<8x128xf32>
    %35 = vector.shape_cast %31 : vector<8x128xf32> to vector<1x8x128xf32>
    tpu.vector_store %arg9[%32, %c0_25, %c0_26], %35 {strides = array<i32>} : memref<8x8x128xf32, #tpu.memory_space<vmem>>, vector<1x8x128xf32>,
    %c2_i32 = arith.constant 2 : i32
    %36 = arith.index_cast %c2_i32 : i32 to index
    %c0_27 = arith.constant 0 : index
    %c0_28 = arith.constant 0 : index
    %37 = vector.load %arg9[%36, %c0_27, %c0_28] : memref<8x8x128xf32, #tpu.memory_space<vmem>>, vector<1x8x128xf32>
    %38 = vector.shape_cast %37 : vector<1x8x128xf32> to vector<8x128xf32>
    %cst_29 = arith.constant dense<0.000000e+00> : vector<8x128xf32>
    %39 = tpu.matmul %31, %12, %cst_29 {dimension_numbers = #tpu.dot_dimension_numbers<[1], [0], [0], [1], [0, 0, 1, 1], [], []>} : vector<8x128xf32>, vector<128x128xf32>, vector<8x128xf32> -> vector<8x128xf32>
    %40 = arith.addf %38, %39 : vector<8x128xf32>
    %cst_30 = arith.constant 0.000000e+00 : f32
    %41 = vector.broadcast %cst_30 : f32 to vector<8x128xf32>
    %42 = arith.maximumf %40, %41 : vector<8x128xf32>
    %43 = arith.index_cast %c2_i32 : i32 to index
    %c0_31 = arith.constant 0 : index
    %c0_32 = arith.constant 0 : index
    %44 = vector.load %arg9[%43, %c0_31, %c0_32] : memref<8x8x128xf32, #tpu.memory_space<vmem>>, vector<1x8x128xf32>
    %45 = vector.shape_cast %44 : vector<1x8x128xf32> to vector<8x128xf32>
    %46 = vector.shape_cast %42 : vector<8x128xf32> to vector<1x8x128xf32>
    tpu.vector_store %arg9[%43, %c0_31, %c0_32], %46 {strides = array<i32>} : memref<8x8x128xf32, #tpu.memory_space<vmem>>, vector<1x8x128xf32>,
    %c3_i32 = arith.constant 3 : i32
    %47 = arith.index_cast %c3_i32 : i32 to index
    %c0_33 = arith.constant 0 : index
    %c0_34 = arith.constant 0 : index
    %48 = vector.load %arg9[%47, %c0_33, %c0_34] : memref<8x8x128xf32, #tpu.memory_space<vmem>>, vector<1x8x128xf32>
    %49 = vector.shape_cast %48 : vector<1x8x128xf32> to vector<8x128xf32>
    %cst_35 = arith.constant dense<0.000000e+00> : vector<8x128xf32>
    %50 = tpu.matmul %42, %12, %cst_35 {dimension_numbers = #tpu.dot_dimension_numbers<[1], [0], [0], [1], [0, 0, 1, 1], [], []>} : vector<8x128xf32>, vector<128x128xf32>, vector<8x128xf32> -> vector<8x128xf32>
    %51 = arith.addf %49, %50 : vector<8x128xf32>
    %cst_36 = arith.constant 0.000000e+00 : f32
    %52 = vector.broadcast %cst_36 : f32 to vector<8x128xf32>
    %53 = arith.maximumf %51, %52 : vector<8x128xf32>
    %54 = arith.index_cast %c3_i32 : i32 to index
    %c0_37 = arith.constant 0 : index
    %c0_38 = arith.constant 0 : index
    %55 = vector.load %arg9[%54, %c0_37, %c0_38] : memref<8x8x128xf32, #tpu.memory_space<vmem>>, vector<1x8x128xf32>
    %56 = vector.shape_cast %55 : vector<1x8x128xf32> to vector<8x128xf32>
    %57 = vector.shape_cast %53 : vector<8x128xf32> to vector<1x8x128xf32>
    tpu.vector_store %arg9[%54, %c0_37, %c0_38], %57 {strides = array<i32>} : memref<8x8x128xf32, #tpu.memory_space<vmem>>, vector<1x8x128xf32>,
    %c4_i32 = arith.constant 4 : i32
    %58 = arith.index_cast %c4_i32 : i32 to index
    %c0_39 = arith.constant 0 : index
    %c0_40 = arith.constant 0 : index
    %59 = vector.load %arg9[%58, %c0_39, %c0_40] : memref<8x8x128xf32, #tpu.memory_space<vmem>>, vector<1x8x128xf32>
    %60 = vector.shape_cast %59 : vector<1x8x128xf32> to vector<8x128xf32>
    %cst_41 = arith.constant dense<0.000000e+00> : vector<8x128xf32>
    %61 = tpu.matmul %53, %12, %cst_41 {dimension_numbers = #tpu.dot_dimension_numbers<[1], [0], [0], [1], [0, 0, 1, 1], [], []>} : vector<8x128xf32>, vector<128x128xf32>, vector<8x128xf32> -> vector<8x128xf32>
    %62 = arith.addf %60, %61 : vector<8x128xf32>
    %cst_42 = arith.constant 0.000000e+00 : f32
    %63 = vector.broadcast %cst_42 : f32 to vector<8x128xf32>
    %64 = arith.maximumf %62, %63 : vector<8x128xf32>
    %65 = arith.index_cast %c4_i32 : i32 to index
    %c0_43 = arith.constant 0 : index
    %c0_44 = arith.constant 0 : index
    %66 = vector.load %arg9[%65, %c0_43, %c0_44] : memref<8x8x128xf32, #tpu.memory_space<vmem>>, vector<1x8x128xf32>
    %67 = vector.shape_cast %66 : vector<1x8x128xf32> to vector<8x128xf32>
    %68 = vector.shape_cast %64 : vector<8x128xf32> to vector<1x8x128xf32>
    tpu.vector_store %arg9[%65, %c0_43, %c0_44], %68 {strides = array<i32>} : memref<8x8x128xf32, #tpu.memory_space<vmem>>, vector<1x8x128xf32>,
    %c5_i32 = arith.constant 5 : i32
    %69 = arith.index_cast %c5_i32 : i32 to index
    %c0_45 = arith.constant 0 : index
    %c0_46 = arith.constant 0 : index
    %70 = vector.load %arg9[%69, %c0_45, %c0_46] : memref<8x8x128xf32, #tpu.memory_space<vmem>>, vector<1x8x128xf32>
    %71 = vector.shape_cast %70 : vector<1x8x128xf32> to vector<8x128xf32>
    %cst_47 = arith.constant dense<0.000000e+00> : vector<8x128xf32>
    %72 = tpu.matmul %64, %12, %cst_47 {dimension_numbers = #tpu.dot_dimension_numbers<[1], [0], [0], [1], [0, 0, 1, 1], [], []>} : vector<8x128xf32>, vector<128x128xf32>, vector<8x128xf32> -> vector<8x128xf32>
    %73 = arith.addf %71, %72 : vector<8x128xf32>
    %cst_48 = arith.constant 0.000000e+00 : f32
    %74 = vector.broadcast %cst_48 : f32 to vector<8x128xf32>
    %75 = arith.maximumf %73, %74 : vector<8x128xf32>
    %76 = arith.index_cast %c5_i32 : i32 to index
    %c0_49 = arith.constant 0 : index
    %c0_50 = arith.constant 0 : index
    %77 = vector.load %arg9[%76, %c0_49, %c0_50] : memref<8x8x128xf32, #tpu.memory_space<vmem>>, vector<1x8x128xf32>
    %78 = vector.shape_cast %77 : vector<1x8x128xf32> to vector<8x128xf32>
    %79 = vector.shape_cast %75 : vector<8x128xf32> to vector<1x8x128xf32>
    tpu.vector_store %arg9[%76, %c0_49, %c0_50], %79 {strides = array<i32>} : memref<8x8x128xf32, #tpu.memory_space<vmem>>, vector<1x8x128xf32>,
    %c6_i32 = arith.constant 6 : i32
    %80 = arith.index_cast %c6_i32 : i32 to index
    %c0_51 = arith.constant 0 : index
    %c0_52 = arith.constant 0 : index
    %81 = vector.load %arg9[%80, %c0_51, %c0_52] : memref<8x8x128xf32, #tpu.memory_space<vmem>>, vector<1x8x128xf32>
    %82 = vector.shape_cast %81 : vector<1x8x128xf32> to vector<8x128xf32>
    %cst_53 = arith.constant dense<0.000000e+00> : vector<8x128xf32>
    %83 = tpu.matmul %75, %12, %cst_53 {dimension_numbers = #tpu.dot_dimension_numbers<[1], [0], [0], [1], [0, 0, 1, 1], [], []>} : vector<8x128xf32>, vector<128x128xf32>, vector<8x128xf32> -> vector<8x128xf32>
    %84 = arith.addf %82, %83 : vector<8x128xf32>
    %cst_54 = arith.constant 0.000000e+00 : f32
    %85 = vector.broadcast %cst_54 : f32 to vector<8x128xf32>
    %86 = arith.maximumf %84, %85 : vector<8x128xf32>
    %87 = arith.index_cast %c6_i32 : i32 to index
    %c0_55 = arith.constant 0 : index
    %c0_56 = arith.constant 0 : index
    %88 = vector.load %arg9[%87, %c0_55, %c0_56] : memref<8x8x128xf32, #tpu.memory_space<vmem>>, vector<1x8x128xf32>
    %89 = vector.shape_cast %88 : vector<1x8x128xf32> to vector<8x128xf32>
    %90 = vector.shape_cast %86 : vector<8x128xf32> to vector<1x8x128xf32>
    tpu.vector_store %arg9[%87, %c0_55, %c0_56], %90 {strides = array<i32>} : memref<8x8x128xf32, #tpu.memory_space<vmem>>, vector<1x8x128xf32>,
    %c7_i32 = arith.constant 7 : i32
    %91 = arith.index_cast %c7_i32 : i32 to index
    %c0_57 = arith.constant 0 : index
    %c0_58 = arith.constant 0 : index
    %92 = vector.load %arg9[%91, %c0_57, %c0_58] : memref<8x8x128xf32, #tpu.memory_space<vmem>>, vector<1x8x128xf32>
    %93 = vector.shape_cast %92 : vector<1x8x128xf32> to vector<8x128xf32>
    %cst_59 = arith.constant dense<0.000000e+00> : vector<8x128xf32>
    %94 = tpu.matmul %86, %12, %cst_59 {dimension_numbers = #tpu.dot_dimension_numbers<[1], [0], [0], [1], [0, 0, 1, 1], [], []>} : vector<8x128xf32>, vector<128x128xf32>, vector<8x128xf32> -> vector<8x128xf32>
    %95 = arith.addf %93, %94 : vector<8x128xf32>
    %cst_60 = arith.constant 0.000000e+00 : f32
    %96 = vector.broadcast %cst_60 : f32 to vector<8x128xf32>
    %97 = arith.maximumf %95, %96 : vector<8x128xf32>
    %98 = arith.index_cast %c7_i32 : i32 to index
    %c0_61 = arith.constant 0 : index
    %c0_62 = arith.constant 0 : index
    %99 = vector.load %arg9[%98, %c0_61, %c0_62] : memref<8x8x128xf32, #tpu.memory_space<vmem>>, vector<1x8x128xf32>
    %100 = vector.shape_cast %99 : vector<1x8x128xf32> to vector<8x128xf32>
    %101 = vector.shape_cast %97 : vector<8x128xf32> to vector<1x8x128xf32>
    tpu.vector_store %arg9[%98, %c0_61, %c0_62], %101 {strides = array<i32>} : memref<8x8x128xf32, #tpu.memory_space<vmem>>, vector<1x8x128xf32>,
    %c8_i32 = arith.constant 8 : i32
    %c0_63 = arith.constant 0 : index
    %c0_64 = arith.constant 0 : index
    %102 = vector.load %arg10[%c0_63, %c0_64] : memref<8x128xf32, #tpu.memory_space<vmem>>, vector<8x128xf32>
    tpu.vector_store %arg10[%c0_63, %c0_64], %97 {strides = array<i32>} : memref<8x128xf32, #tpu.memory_space<vmem>>, vector<8x128xf32>,
    %c0_65 = arith.constant 0 : index
    %c0_66 = arith.constant 0 : index
    %c0_67 = arith.constant 0 : index
    %103 = vector.load %arg9[%c0_65, %c0_66, %c0_67] : memref<8x8x128xf32, #tpu.memory_space<vmem>>, vector<8x8x128xf32>
    %104 = vector.shape_cast %103 : vector<8x8x128xf32> to vector<64x128xf32>
    %c0_68 = arith.constant 0 : index
    %c0_69 = arith.constant 0 : index
    %105 = vector.load %arg6[%c0_68, %c0_69] : memref<128x3xf32, #tpu.memory_space<vmem>>, vector<128x3xf32>
    %cst_70 = arith.constant dense<0.000000e+00> : vector<64x3xf32>
    %106 = tpu.matmul %104, %105, %cst_70 {dimension_numbers = #tpu.dot_dimension_numbers<[1], [0], [0], [1], [0, 0, 1, 1], [], []>} : vector<64x128xf32>, vector<128x3xf32>, vector<64x3xf32> -> vector<64x3xf32>
    %c0_71 = arith.constant 0 : index
    %c0_72 = arith.constant 0 : index
    %107 = vector.load %arg7[%c0_71, %c0_72] : memref<1x3xf32, #tpu.memory_space<vmem>>, vector<1x3xf32>
    %108 = vector.broadcast %107 : vector<1x3xf32> to vector<64x3xf32>
    %109 = arith.addf %106, %108 : vector<64x3xf32>
    %110 = vector.shape_cast %109 : vector<64x3xf32> to vector<8x8x3xf32>
    %c0_73 = arith.constant 0 : index
    %c0_74 = arith.constant 0 : index
    %c0_75 = arith.constant 0 : index
    %111 = vector.load %arg8[%c0_73, %c0_74, %c0_75] : memref<8x8x3xf32, #tpu.memory_space<vmem>>, vector<8x8x3xf32>
    tpu.vector_store %arg8[%c0_73, %c0_74, %c0_75], %110 {strides = array<i32>} : memref<8x8x3xf32, #tpu.memory_space<vmem>>, vector<8x8x3xf32>,
    return
  }
  func.func @transform_0(%arg0: i32) -> (i32, i32, i32) {
    %c0_i32 = arith.constant 0 : i32
    %c0_i32_0 = arith.constant 0 : i32
    %c0_i32_1 = arith.constant 0 : i32
    return %arg0, %c0_i32, %c0_i32_0 : i32, i32, i32
  }
  func.func @transform_1(%arg0: i32) -> (i32, i32) {
    %c0_i32 = arith.constant 0 : i32
    %c0_i32_0 = arith.constant 0 : i32
    %c0_i32_1 = arith.constant 0 : i32
    return %c0_i32, %c0_i32_0 : i32, i32
  }
  func.func @transform_2(%arg0: i32) -> (i32, i32) {
    %c0_i32 = arith.constant 0 : i32
    %c0_i32_0 = arith.constant 0 : i32
    %c0_i32_1 = arith.constant 0 : i32
    return %c0_i32, %c0_i32_0 : i32, i32
  }
  func.func @transform_3(%arg0: i32) -> (i32, i32) {
    %c0_i32 = arith.constant 0 : i32
    %c0_i32_0 = arith.constant 0 : i32
    %c0_i32_1 = arith.constant 0 : i32
    return %c0_i32, %c0_i32_0 : i32, i32
  }
  func.func @transform_4(%arg0: i32) -> (i32, i32) {
    %c0_i32 = arith.constant 0 : i32
    %c0_i32_0 = arith.constant 0 : i32
    %c0_i32_1 = arith.constant 0 : i32
    return %c0_i32, %c0_i32_0 : i32, i32
  }
  func.func @transform_5(%arg0: i32) -> (i32, i32) {
    %c0_i32 = arith.constant 0 : i32
    %c0_i32_0 = arith.constant 0 : i32
    %c0_i32_1 = arith.constant 0 : i32
    return %c0_i32, %c0_i32_0 : i32, i32
  }
  func.func @transform_6(%arg0: i32) -> (i32, i32) {
    %c0_i32 = arith.constant 0 : i32
    %c0_i32_0 = arith.constant 0 : i32
    %c0_i32_1 = arith.constant 0 : i32
    return %c0_i32, %c0_i32_0 : i32, i32
  }
  func.func @transform_7(%arg0: i32) -> (i32, i32, i32) {
    %c0_i32 = arith.constant 0 : i32
    %c0_i32_0 = arith.constant 0 : i32
    %c0_i32_1 = arith.constant 0 : i32
    return %arg0, %c0_i32, %c0_i32_0 : i32, i32, i32
  }
  func.func @transform_8(%arg0: i32) -> (i32, i32, i32) {
    %c0_i32 = arith.constant 0 : i32
    %c0_i32_0 = arith.constant 0 : i32
    %c0_i32_1 = arith.constant 0 : i32
    return %arg0, %c0_i32, %c0_i32_0 : i32, i32, i32
  }
}

</mosaic_0001>

<bundles_post_ra>
// kernel: tpu_custom_call.1
= control target key start
LH: loop header
LB: loop body
LE: loop exit
PB: predicated region body
PF: predicated region fallthrough
CT: control target
= control target key end

     0   :  { %vm76_vm0 = vcmask 1043456   ;;  %v1520_v1 = vmov 0.0   ;;  %vm51_vm1 = vcmask 31744   ;;  %vm1521_vm2 = vmmov 0   ;;  %s2096_s0 = inlined_call_operand.vmem [shape: f32[8,8,4], index: 0, kind: input, shape index: {}]   ;;  %s2097_s1 = inlined_call_operand.vmem [shape: f32[8,128], index: 1, kind: input, shape index: {}]   ;;  %s2098_s2 = inlined_call_operand.vmem [shape: f32[4,128], index: 2, kind: input, shape index: {}]   ;;  %s2099_s3 = inlined_call_operand.vmem [shape: f32[128,128], index: 3, kind: input, shape index: {}]   ;;  %s2100_s4 = inlined_call_operand.vmem [shape: f32[1,128], index: 4, kind: input, shape index: {}]   ;;  %s2101_s5 = inlined_call_operand.vmem [shape: f32[128,3], index: 5, kind: input, shape index: {}]   ;;  %s2102_s6 = inlined_call_operand.vmem [shape: f32[1,3], index: 6, kind: input, shape index: {}]   ;;  %s2103_s7 = inlined_call_operand.vmem [shape: f32[8,8,3], index: 7, kind: output, shape index: {0}]   ;;  %s2104_s8 = inlined_call_operand.hbm [shape: f32[8,8,128], index: 8, kind: output, shape index: {1}]  }
   0x1   :  { %v1573_v0 = vld [vmem:[%s2099_s3 + $0x78] sm:$0xff]  ;;  %1169 = vmatprep.subr.mxu0 %v1520_v1  ;;  %v1579_v2 = vld [vmem:[%s2099_s3 + $0x70] sm:$0xff]  ;;  %v43_v3 = vld [vmem:[%s2098_s2] sm:$0xf]  ;;  %1201 = vmatprep.mubr.msk.f32.mxu0 %vm1521_vm2, %v1520_v1 }
   0x2   :  { %1170 = vmatpush3.msra.mxu0 %v1573_v0  ;;  %v1591_v4 = vld [vmem:[%s2099_s3 + $0x68] sm:$0xff]  ;;  %1155 = vmatprep.subr.msk.mxu1 %vm76_vm0, %v43_v3  ;;  %v35_v5 = vld [vmem:[%s2096_s0] sm:$0xff] }
   0x3   :  { %1171 = vmatprep.subr.mxu0 %v1520_v1  ;;  %v36_v6 = vld [vmem:[%s2096_s0 + $0x8] sm:$0xff]  ;;  %1156 = vmatpush3.msk.msra.mxu1 %vm76_vm0, %v43_v3  ;;  %v1604_v7 = vld [vmem:[%s2099_s3 + $0x60] sm:$0xff] }
   0x4   :  { %1172 = vmatpush3.msra.mxu0 %v1579_v2  ;;  %1157 = vmatprep.mubr.msk.f32.mxu1 %vm51_vm1, %v35_v5 }
   0x5   :  { %1173 = vmatprep.subr.mxu0 %v1520_v1  ;;  %1158 = vmatmul.mubr.msk.f32.vlgmr.msra.gmra.mxu1 %vm51_vm1, %v36_v6 }
   0x6   :  { %1174 = vmatpush3.msra.mxu0 %v1591_v4 }
   0x7   :  { %14 = vsyncpa [#allocation4], 0  ;;  %1175 = vmatprep.subr.mxu0 %v1520_v1  ;;  %v1613_v8 = vld [vmem:[%s2099_s3 + $0x58] sm:$0xff]  ;;  %1239 = vmatprep.subr.mxu1 %v1520_v1  ;;  %v1622_v9 = vld [vmem:[%s2099_s3 + $0x50] sm:$0xff]  ;;  %vm946_vm3 = vcmask 23552   ;;  %s1522_s23 = smov [#allocation3]  }
   0x8   :  { %1176 = vmatpush3.msra.mxu0 %v1604_v7  ;;  %1240 = vmatpush3.msra.mxu1 %v1573_v0  ;;  %v1631_v10 = vld [vmem:[%s2099_s3 + $0x48] sm:$0xff]  ;;  %v1640_v11 = vld [vmem:[%s2099_s3 + $0x40] sm:$0xff]  ;;  %v1649_v12 = vld [vmem:[%s2099_s3 + $0x38] sm:$0xff]  ;;  %s962_s24 = sshll.u32 %s1522_s23, 4  ;;  %s963_s24 = int_to_ptr.vmem [resolvable:$true] %s962_s24 }
   0x9   :  { %1177 = vmatprep.subr.mxu0 %v1520_v1  ;;  %1241 = vmatprep.subr.mxu1 %v1520_v1  ;;  %v1658_v13 = vld [vmem:[%s2099_s3 + $0x30] sm:$0xff]  ;;  %v1667_v14 = vld [vmem:[%s2099_s3 + $0x28] sm:$0xff]  ;;  %v1676_v15 = vld [vmem:[%s2099_s3 + $0x20] sm:$0xff]  ;;  %s1498_s25 = scalar_lea.vmem %s963_s24, 1024  ;;  %p1503_p1 = scmp.lt.s32.totalorder %s963_s24, %s963_s24 }
   0xa   :  { %1178 = vmatpush3.msra.mxu0 %v1613_v8  ;;  %1242 = vmatpush3.msra.mxu1 %v1579_v2  ;;  %v1685_v16 = vld [vmem:[%s2099_s3 + $0x18] sm:$0xff]  ;;  %v1694_v17 = vld [vmem:[%s2099_s3 + $0x10] sm:$0xff]  ;;  %v1703_v18 = vld [vmem:[%s2099_s3 + $0x8] sm:$0xff]  ;;  %p1499_p0 = scmp.ne.s32.totalorder %s963_s24, %s1498_s25  ;;  %p1504_p2 = scmp.lt.s32.totalorder %s1498_s25, %s1498_s25 }
   0xb   :  { %1179 = vmatprep.subr.mxu0 %v1520_v1  ;;  %1243 = vmatprep.subr.mxu1 %v1520_v1  ;;  %v1712_v19 = vld [vmem:[%s2099_s3] sm:$0xff]  ;;  %v37_v21 = vld [vmem:[%s2096_s0 + $0x10] sm:$0xff]  ;;  %v38_v22 = vld [vmem:[%s2096_s0 + $0x18] sm:$0xff] }
   0xc   :  { %1180 = vmatpush3.msra.mxu0 %v1622_v9  ;;  %1244 = vmatpush3.msra.mxu1 %v1591_v4  ;;  %v33_v20 = vld [vmem:[%s2097_s1] sm:$0xff]  ;;  %v40_v24 = vld [vmem:[%s2096_s0 + $0x28] sm:$0xff]  ;;  %v41_v25 = vld [vmem:[%s2096_s0 + $0x30] sm:$0xff]  ;;  %p1505_p3 = por %p1504_p2, %p1503_p1 }
   0xd   :  { %1181 = vmatprep.subr.mxu0 %v1520_v1  ;;  %1245 = vmatprep.subr.mxu1 %v1520_v1  ;;  %v39_v23 = vld [vmem:[%s2096_s0 + $0x20] sm:$0xff]  ;;  %v42_v26 = vld [vmem:[%s2096_s0 + $0x38] sm:$0xff] }
   0xe   :  { %1182 = vmatpush3.msra.mxu0 %v1631_v10  ;;  %1246 = vmatpush3.msra.mxu1 %v1604_v7  ;;  %v1795_v28 = vld [vmem:[%s2100_s4] ss:$0 sm:$0xff]  ;;  %v833_v61 = vld [vmem:[%s2101_s5 + $0x78] sm:$0xff]  ;;  %p1506_p4 = pnand %p1505_p3, %p1499_p0 }
   0xf   :  { %1183 = vmatprep.subr.mxu0 %v1520_v1  ;;  %1247 = vmatprep.subr.mxu1 %v1520_v1  ;;  %v830_v5 = vld [vmem:[%s2101_s5 + $0x60] sm:$0xff]  ;;  %v829_v6 = vld [vmem:[%s2101_s5 + $0x58] sm:$0xff] }
  0x10   :  { %1184 = vmatpush3.msra.mxu0 %v1640_v11  ;;  %1248 = vmatpush3.msra.mxu1 %v1613_v8 }
  0x11   :  { %1185 = vmatprep.subr.mxu0 %v1520_v1  ;;  %1249 = vmatprep.subr.mxu1 %v1520_v1 }
  0x12   :  { %1186 = vmatpush3.msra.mxu0 %v1649_v12  ;;  %1250 = vmatpush3.msra.mxu1 %v1622_v9 }
  0x13   :  { %1187 = vmatprep.subr.mxu0 %v1520_v1  ;;  %1251 = vmatprep.subr.mxu1 %v1520_v1 }
  0x14   :  { %1188 = vmatpush3.msra.mxu0 %v1658_v13  ;;  %1252 = vmatpush3.msra.mxu1 %v1631_v10 }
  0x15   :  { %1189 = vmatprep.subr.mxu0 %v1520_v1  ;;  %1253 = vmatprep.subr.mxu1 %v1520_v1 }
  0x16   :  { %1190 = vmatpush3.msra.mxu0 %v1667_v14  ;;  %1254 = vmatpush3.msra.mxu1 %v1640_v11 }
  0x17   :  { %1191 = vmatprep.subr.mxu0 %v1520_v1  ;;  %1255 = vmatprep.subr.mxu1 %v1520_v1 }
  0x18   :  { %1192 = vmatpush3.msra.mxu0 %v1676_v15  ;;  %1256 = vmatpush3.msra.mxu1 %v1649_v12 }
  0x19   :  { %1193 = vmatprep.subr.mxu0 %v1520_v1  ;;  %1257 = vmatprep.subr.mxu1 %v1520_v1 }
  0x1a   :  { %1194 = vmatpush3.msra.mxu0 %v1685_v16  ;;  %1258 = vmatpush3.msra.mxu1 %v1658_v13 }
  0x1b   :  { %1195 = vmatprep.subr.mxu0 %v1520_v1  ;;  %1259 = vmatprep.subr.mxu1 %v1520_v1 }
  0x1c   :  { %1196 = vmatpush3.msra.mxu0 %v1694_v17  ;;  %1260 = vmatpush3.msra.mxu1 %v1667_v14 }
  0x1d   :  { %1197 = vmatprep.subr.mxu0 %v1520_v1  ;;  %1261 = vmatprep.subr.mxu1 %v1520_v1 }
  0x1e   :  { %1198 = vmatpush3.msra.mxu0 %v1703_v18  ;;  %1262 = vmatpush3.msra.mxu1 %v1676_v15 }
  0x1f   :  { %1199 = vmatprep.subr.mxu0 %v1520_v1  ;;  %1263 = vmatprep.subr.mxu1 %v1520_v1 }
  0x20   :  { %1200 = vmatpush3.msra.mxu0 %v1712_v19  ;;  %1264 = vmatpush3.msra.mxu1 %v1685_v16 }
  0x21   :  { %1202 = vmatmul.mubr.f32.vlgmr.msra.gmra.mxu0 %v33_v20  ;;  %1204 = vmatprep.subr.mxu0 %v1520_v1 }
  0x22   :  { %1205 = vmatpush3.msra.mxu0 %v1573_v0  ;;  %1236 = vmatprep.mubr.msk.f32.mxu0 %vm1521_vm2, %v1520_v1 }
  0x23   :  { %1206 = vmatprep.subr.mxu0 %v1520_v1  ;;  %1265 = vmatprep.subr.mxu1 %v1520_v1 }
  0x24   :  { %1207 = vmatpush3.msra.mxu0 %v1579_v2  ;;  %1266 = vmatpush3.msra.mxu1 %v1694_v17 }
  0x25   :  { %1208 = vmatprep.subr.mxu0 %v1520_v1  ;;  %1267 = vmatprep.subr.mxu1 %v1520_v1 }
  0x26   :  { %1209 = vmatpush3.msra.mxu0 %v1591_v4  ;;  %1268 = vmatpush3.msra.mxu1 %v1703_v18 }
  0x27   :  { %1210 = vmatprep.subr.mxu0 %v1520_v1  ;;  %1269 = vmatprep.subr.mxu1 %v1520_v1 }
  0x28   :  { %1211 = vmatpush3.msra.mxu0 %v1604_v7  ;;  %1270 = vmatpush3.msra.mxu1 %v1712_v19 }
  0x29   :  { %1212 = vmatprep.subr.mxu0 %v1520_v1  ;;  %1309 = vmatprep.subr.mxu1 %v1520_v1 }
  0x2a   :  { %1213 = vmatpush3.msra.mxu0 %v1613_v8  ;;  %1160 = vmatprep.mubr.msk.f32.mxu1 %vm51_vm1, %v37_v21 }
  0x2b   :  { %1214 = vmatprep.subr.mxu0 %v1520_v1  ;;  %1161 = vmatmul.mubr.msk.f32.gmra.mxu1 %vm51_vm1, %v38_v22 }
  0x2c   :  { %1215 = vmatpush3.msra.mxu0 %v1622_v9  ;;  %1163 = vmatprep.mubr.msk.f32.mxu1 %vm51_vm1, %v39_v23  ;;  %v985_v23 = vld [vmem:[%s2102_s6] ss:$0 sm:$0xff] }
  0x2d   :  { %1216 = vmatprep.subr.mxu0 %v1520_v1 }
  0x2e   :  { %1217 = vmatpush3.msra.mxu0 %v1631_v10 }
  0x2f   :  { %1218 = vmatprep.subr.mxu0 %v1520_v1  ;;  %1164 = vmatmul.mubr.msk.f32.gmra.mxu1 %vm51_vm1, %v40_v24 }
  0x30   :  { %1219 = vmatpush3.msra.mxu0 %v1640_v11  ;;  %1166 = vmatprep.mubr.msk.f32.mxu1 %vm51_vm1, %v41_v25 }
  0x31   :  { %1220 = vmatprep.subr.mxu0 %v1520_v1 }
  0x32   :  { %1221 = vmatpush3.msra.mxu0 %v1649_v12 }
  0x33   :  { %1222 = vmatprep.subr.mxu0 %v1520_v1  ;;  %1167 = vmatmul.mubr.msk.f32.gmra.mxu1 %vm51_vm1, %v42_v26 }
  0x34   :  { %1223 = vmatpush3.msra.mxu0 %v1658_v13  ;;  %1271 = vmatprep.mubr.msk.f32.mxu1 %vm1521_vm2, %v1520_v1 }
  0x35   :  { %1224 = vmatprep.subr.mxu0 %v1520_v1 }
  0x36   :  { %1225 = vmatpush3.msra.mxu0 %v1667_v14 }
  0x37   :  { %1226 = vmatprep.subr.mxu0 %v1520_v1 }
  0x38   :  { %1227 = vmatpush3.msra.mxu0 %v1676_v15 }
  0x39   :  { %1228 = vmatprep.subr.mxu0 %v1520_v1 }
  0x3a   :  { %1229 = vmatpush3.msra.mxu0 %v1685_v16 }
  0x3b   :  { %1230 = vmatprep.subr.mxu0 %v1520_v1 }
  0x3c   :  { %1231 = vmatpush3.msra.mxu0 %v1694_v17 }
  0x3d   :  { %1232 = vmatprep.subr.mxu0 %v1520_v1 }
  0x3e   :  { %1233 = vmatpush3.msra.mxu0 %v1703_v18 }
  0x3f   :  { %1234 = vmatprep.subr.mxu0 %v1520_v1 }
  0x40   :  { %1235 = vmatpush3.msra.mxu0 %v1712_v19 }
  0x41   :  { %1274 = vmatprep.subr.mxu0 %v1520_v1 }
  0xc5   :  { %v1159_v27 = vpop.f32.mrf.mxu1 }
  0xc6   :  { %v152_v35 = vadd.f32 %v1159_v27, %v1795_v28 }
  0xc7   :  { %v146_v29 = vpop.f32.mrf.mxu1 }
  0xc8   :  { %v147_v30 = vadd.f32 %v1795_v28, %v146_v29 }
  0xe1   :  { %v277_v31 = vpop.f32.mrf.mxu0 }
  0xe2   :  { %v281_v32 = vadd.f32 %v277_v31, %v147_v30 }
  0xe3   :  { %v1203_v33 = vpop.f32.mrf.mxu0 }
  0xe4   :  { %v1798_v34 = vmax.f32 %v281_v32, 0.0 }
  0xe6   :  { %283 = vst [vmem:[#allocation3] sm:$0xff] %v1798_v34  ;;  %1237 = vmatmul.mubr.f32.vlgmr.msra.gmra.mxu0 %v1798_v34 }
  0xe7   :  { %1275 = vmatpush3.msra.mxu0 %v1573_v0  ;;  %1306 = vmatprep.mubr.msk.f32.mxu0 %vm1521_vm2, %v1520_v1 }
  0xe8   :  { %1276 = vmatprep.subr.mxu0 %v1520_v1 }
  0xe9   :  { %1277 = vmatpush3.msra.mxu0 %v1579_v2 }
  0xea   :  { %1278 = vmatprep.subr.mxu0 %v1520_v1 }
  0xeb   :  { %1279 = vmatpush3.msra.mxu0 %v1591_v4  ;;  %v1162_v40 = vpop.f32.mrf.mxu1 }
  0xec   :  { %1280 = vmatprep.subr.mxu0 %v1520_v1  ;;  %v162_v51 = vadd.f32 %v1162_v40, %v1795_v28 }
  0xed   :  { %1281 = vmatpush3.msra.mxu0 %v1604_v7  ;;  %v156_v41 = vpop.f32.mrf.mxu1 }
  0xee   :  { %1282 = vmatprep.subr.mxu0 %v1520_v1  ;;  %v157_v46 = vadd.f32 %v1795_v28, %v156_v41 }
  0xef   :  { %1283 = vmatpush3.msra.mxu0 %v1613_v8  ;;  %v1875_v42 = vpop.f32.mrf.mxu1 }
  0xf0   :  { %1284 = vmatprep.subr.mxu0 %v1520_v1  ;;  %v172_v62 = vadd.f32 %v1875_v42, %v1795_v28 }
  0xf1   :  { %1285 = vmatpush3.msra.mxu0 %v1622_v9  ;;  %v1877_v43 = vpop.f32.mrf.mxu1 }
  0xf2   :  { %1286 = vmatprep.subr.mxu0 %v1520_v1  ;;  %v167_v56 = vadd.f32 %v1795_v28, %v1877_v43 }
  0xf3   :  { %1287 = vmatpush3.msra.mxu0 %v1631_v10  ;;  %v1879_v44 = vpop.f32.mrf.mxu1 }
  0xf4   :  { %1288 = vmatprep.subr.mxu0 %v1520_v1 }
  0xf5   :  { %1289 = vmatpush3.msra.mxu0 %v1640_v11  ;;  %v1881_v45 = vpop.f32.mrf.mxu1 }
  0xf6   :  { %1290 = vmatprep.subr.mxu0 %v1520_v1 }
  0xf7   :  { %1291 = vmatpush3.msra.mxu0 %v1649_v12 }
  0xf8   :  { %1292 = vmatprep.subr.mxu0 %v1520_v1 }
  0xf9   :  { %1293 = vmatpush3.msra.mxu0 %v1658_v13 }
  0xfa   :  { %1294 = vmatprep.subr.mxu0 %v1520_v1 }
  0xfb   :  { %1295 = vmatpush3.msra.mxu0 %v1667_v14 }
  0xfc   :  { %1296 = vmatprep.subr.mxu0 %v1520_v1 }
  0xfd   :  { %1297 = vmatpush3.msra.mxu0 %v1676_v15 }
  0xfe   :  { %1298 = vmatprep.subr.mxu0 %v1520_v1 }
  0xff   :  { %1299 = vmatpush3.msra.mxu0 %v1685_v16 }
 0x100   :  { %1300 = vmatprep.subr.mxu0 %v1520_v1 }
 0x101   :  { %1301 = vmatpush3.msra.mxu0 %v1694_v17 }
 0x102   :  { %1302 = vmatprep.subr.mxu0 %v1520_v1 }
 0x103   :  { %1303 = vmatpush3.msra.mxu0 %v1703_v18 }
 0x104   :  { %1304 = vmatprep.subr.mxu0 %v1520_v1 }
 0x105   :  { %1305 = vmatpush3.msra.mxu0 %v1712_v19 }
 0x106   :  { %1344 = vmatprep.subr.mxu0 %v1520_v1 }
 0x1a6   :  { %v352_v36 = vpop.f32.mrf.mxu0 }
 0x1a7   :  { %v356_v37 = vadd.f32 %v352_v36, %v152_v35 }
 0x1a8   :  { %v1238_v38 = vpop.f32.mrf.mxu0 }
 0x1a9   :  { %v1837_v39 = vmax.f32 %v356_v37, 0.0  ;;  %v182_v37 = vadd.f32 %v1879_v44, %v1795_v28 }
 0x1ab   :  { %358 = vst [vmem:[#allocation3 + $0x8] sm:$0xff] %v1837_v39  ;;  %1272 = vmatmul.mubr.f32.vlgmr.msra.gmra.mxu1 %v1837_v39 }
 0x1ac   :  { %1310 = vmatpush3.msra.mxu1 %v1573_v0  ;;  %1341 = vmatprep.mubr.msk.f32.mxu1 %vm1521_vm2, %v1520_v1 }
 0x1ad   :  { %1311 = vmatprep.subr.mxu1 %v1520_v1 }
 0x1ae   :  { %1312 = vmatpush3.msra.mxu1 %v1579_v2 }
 0x1af   :  { %1313 = vmatprep.subr.mxu1 %v1520_v1 }
 0x1b0   :  { %1314 = vmatpush3.msra.mxu1 %v1591_v4 }
 0x1b1   :  { %1315 = vmatprep.subr.mxu1 %v1520_v1 }
 0x1b2   :  { %1316 = vmatpush3.msra.mxu1 %v1604_v7 }
 0x1b3   :  { %1317 = vmatprep.subr.mxu1 %v1520_v1 }
 0x1b4   :  { %1318 = vmatpush3.msra.mxu1 %v1613_v8 }
 0x1b5   :  { %1319 = vmatprep.subr.mxu1 %v1520_v1 }
 0x1b6   :  { %1320 = vmatpush3.msra.mxu1 %v1622_v9 }
 0x1b7   :  { %1321 = vmatprep.subr.mxu1 %v1520_v1 }
 0x1b8   :  { %1322 = vmatpush3.msra.mxu1 %v1631_v10 }
 0x1b9   :  { %1323 = vmatprep.subr.mxu1 %v1520_v1 }
 0x1ba   :  { %1324 = vmatpush3.msra.mxu1 %v1640_v11 }
 0x1bb   :  { %1325 = vmatprep.subr.mxu1 %v1520_v1 }
 0x1bc   :  { %1326 = vmatpush3.msra.mxu1 %v1649_v12 }
 0x1bd   :  { %1327 = vmatprep.subr.mxu1 %v1520_v1 }
 0x1be   :  { %1328 = vmatpush3.msra.mxu1 %v1658_v13 }
 0x1bf   :  { %1329 = vmatprep.subr.mxu1 %v1520_v1 }
 0x1c0   :  { %1330 = vmatpush3.msra.mxu1 %v1667_v14 }
 0x1c1   :  { %1331 = vmatprep.subr.mxu1 %v1520_v1 }
 0x1c2   :  { %1332 = vmatpush3.msra.mxu1 %v1676_v15 }
 0x1c3   :  { %1333 = vmatprep.subr.mxu1 %v1520_v1 }
 0x1c4   :  { %1334 = vmatpush3.msra.mxu1 %v1685_v16 }
 0x1c5   :  { %1335 = vmatprep.subr.mxu1 %v1520_v1 }
 0x1c6   :  { %1336 = vmatpush3.msra.mxu1 %v1694_v17 }
 0x1c7   :  { %1337 = vmatprep.subr.mxu1 %v1520_v1 }
 0x1c8   :  { %1338 = vmatpush3.msra.mxu1 %v1703_v18 }
 0x1c9   :  { %1339 = vmatprep.subr.mxu1 %v1520_v1 }
 0x1ca   :  { %1340 = vmatpush3.msra.mxu1 %v1712_v19 }
 0x1cb   :  { %1379 = vmatprep.subr.mxu1 %v1520_v1 }
 0x26b   :  { %v427_v47 = vpop.f32.mrf.mxu1 }
 0x26c   :  { %v431_v48 = vadd.f32 %v427_v47, %v157_v46 }
 0x26d   :  { %v1273_v49 = vpop.f32.mrf.mxu1 }
 0x26e   :  { %v1884_v50 = vmax.f32 %v431_v48, 0.0 }
 0x270   :  { %433 = vst [vmem:[#allocation3 + $0x10] sm:$0xff] %v1884_v50  ;;  %1307 = vmatmul.mubr.f32.vlgmr.msra.gmra.mxu0 %v1884_v50 }
 0x271   :  { %1345 = vmatpush3.msra.mxu0 %v1573_v0  ;;  %1376 = vmatprep.mubr.msk.f32.mxu0 %vm1521_vm2, %v1520_v1 }
 0x272   :  { %1346 = vmatprep.subr.mxu0 %v1520_v1 }
 0x273   :  { %1347 = vmatpush3.msra.mxu0 %v1579_v2 }
 0x274   :  { %1348 = vmatprep.subr.mxu0 %v1520_v1 }
 0x275   :  { %1349 = vmatpush3.msra.mxu0 %v1591_v4 }
 0x276   :  { %1350 = vmatprep.subr.mxu0 %v1520_v1 }
 0x277   :  { %1351 = vmatpush3.msra.mxu0 %v1604_v7 }
 0x278   :  { %1352 = vmatprep.subr.mxu0 %v1520_v1 }
 0x279   :  { %1353 = vmatpush3.msra.mxu0 %v1613_v8 }
 0x27a   :  { %1354 = vmatprep.subr.mxu0 %v1520_v1 }
 0x27b   :  { %1355 = vmatpush3.msra.mxu0 %v1622_v9 }
 0x27c   :  { %1356 = vmatprep.subr.mxu0 %v1520_v1 }
 0x27d   :  { %1357 = vmatpush3.msra.mxu0 %v1631_v10 }
 0x27e   :  { %1358 = vmatprep.subr.mxu0 %v1520_v1 }
 0x27f   :  { %1359 = vmatpush3.msra.mxu0 %v1640_v11 }
 0x280   :  { %1360 = vmatprep.subr.mxu0 %v1520_v1 }
 0x281   :  { %1361 = vmatpush3.msra.mxu0 %v1649_v12 }
 0x282   :  { %1362 = vmatprep.subr.mxu0 %v1520_v1 }
 0x283   :  { %1363 = vmatpush3.msra.mxu0 %v1658_v13 }
 0x284   :  { %1364 = vmatprep.subr.mxu0 %v1520_v1 }
 0x285   :  { %1365 = vmatpush3.msra.mxu0 %v1667_v14 }
 0x286   :  { %1366 = vmatprep.subr.mxu0 %v1520_v1 }
 0x287   :  { %1367 = vmatpush3.msra.mxu0 %v1676_v15 }
 0x288   :  { %1368 = vmatprep.subr.mxu0 %v1520_v1 }
 0x289   :  { %1369 = vmatpush3.msra.mxu0 %v1685_v16 }
 0x28a   :  { %1370 = vmatprep.subr.mxu0 %v1520_v1 }
 0x28b   :  { %1371 = vmatpush3.msra.mxu0 %v1694_v17 }
 0x28c   :  { %1372 = vmatprep.subr.mxu0 %v1520_v1 }
 0x28d   :  { %1373 = vmatpush3.msra.mxu0 %v1703_v18 }
 0x28e   :  { %1374 = vmatprep.subr.mxu0 %v1520_v1 }
 0x28f   :  { %1375 = vmatpush3.msra.mxu0 %v1712_v19 }
 0x290   :  { %1414 = vmatprep.subr.mxu0 %v1520_v1 }
 0x330   :  { %v502_v52 = vpop.f32.mrf.mxu0 }
 0x331   :  { %v506_v53 = vadd.f32 %v502_v52, %v162_v51 }
 0x332   :  { %v1308_v54 = vpop.f32.mrf.mxu0 }
 0x333   :  { %v1923_v55 = vmax.f32 %v506_v53, 0.0 }
 0x335   :  { %508 = vst [vmem:[#allocation3 + $0x18] sm:$0xff] %v1923_v55  ;;  %1342 = vmatmul.mubr.f32.vlgmr.msra.gmra.mxu1 %v1923_v55 }
 0x336   :  { %1380 = vmatpush3.msra.mxu1 %v1573_v0  ;;  %1411 = vmatprep.mubr.msk.f32.mxu1 %vm1521_vm2, %v1520_v1 }
 0x337   :  { %1381 = vmatprep.subr.mxu1 %v1520_v1 }
 0x338   :  { %1382 = vmatpush3.msra.mxu1 %v1579_v2 }
 0x339   :  { %1383 = vmatprep.subr.mxu1 %v1520_v1 }
 0x33a   :  { %1384 = vmatpush3.msra.mxu1 %v1591_v4 }
 0x33b   :  { %1385 = vmatprep.subr.mxu1 %v1520_v1 }
 0x33c   :  { %1386 = vmatpush3.msra.mxu1 %v1604_v7 }
 0x33d   :  { %1387 = vmatprep.subr.mxu1 %v1520_v1 }
 0x33e   :  { %1388 = vmatpush3.msra.mxu1 %v1613_v8 }
 0x33f   :  { %1389 = vmatprep.subr.mxu1 %v1520_v1 }
 0x340   :  { %1390 = vmatpush3.msra.mxu1 %v1622_v9 }
 0x341   :  { %1391 = vmatprep.subr.mxu1 %v1520_v1 }
 0x342   :  { %1392 = vmatpush3.msra.mxu1 %v1631_v10 }
 0x343   :  { %1393 = vmatprep.subr.mxu1 %v1520_v1 }
 0x344   :  { %1394 = vmatpush3.msra.mxu1 %v1640_v11 }
 0x345   :  { %1395 = vmatprep.subr.mxu1 %v1520_v1 }
 0x346   :  { %1396 = vmatpush3.msra.mxu1 %v1649_v12 }
 0x347   :  { %1397 = vmatprep.subr.mxu1 %v1520_v1 }
 0x348   :  { %1398 = vmatpush3.msra.mxu1 %v1658_v13 }
 0x349   :  { %1399 = vmatprep.subr.mxu1 %v1520_v1 }
 0x34a   :  { %1400 = vmatpush3.msra.mxu1 %v1667_v14 }
 0x34b   :  { %1401 = vmatprep.subr.mxu1 %v1520_v1 }
 0x34c   :  { %1402 = vmatpush3.msra.mxu1 %v1676_v15 }
 0x34d   :  { %1403 = vmatprep.subr.mxu1 %v1520_v1 }
 0x34e   :  { %1404 = vmatpush3.msra.mxu1 %v1685_v16 }
 0x34f   :  { %1405 = vmatprep.subr.mxu1 %v1520_v1 }
 0x350   :  { %1406 = vmatpush3.msra.mxu1 %v1694_v17 }
 0x351   :  { %1407 = vmatprep.subr.mxu1 %v1520_v1 }
 0x352   :  { %1408 = vmatpush3.msra.mxu1 %v1703_v18 }
 0x353   :  { %1409 = vmatprep.subr.mxu1 %v1520_v1 }
 0x354   :  { %1410 = vmatpush3.msra.mxu1 %v1712_v19 }
 0x355   :  { %1449 = vmatprep.subr.mxu1 %v833_v61 }
 0x3f5   :  { %v577_v57 = vpop.f32.mrf.mxu1 }
 0x3f6   :  { %v581_v58 = vadd.f32 %v577_v57, %v167_v56 }
 0x3f7   :  { %v1343_v59 = vpop.f32.mrf.mxu1 }
 0x3f8   :  { %v1962_v60 = vmax.f32 %v581_v58, 0.0 }
 0x3fa   :  { %583 = vst [vmem:[#allocation3 + $0x20] sm:$0xff] %v1962_v60  ;;  %1377 = vmatmul.mubr.f32.vlgmr.msra.gmra.mxu0 %v1962_v60 }
 0x3fb   :  { %1415 = vmatpush3.msra.mxu0 %v1573_v0  ;;  %1446 = vmatprep.mubr.msk.f32.mxu0 %vm1521_vm2, %v1520_v1 }
 0x3fc   :  { %1416 = vmatprep.subr.mxu0 %v1520_v1 }
 0x3fd   :  { %1417 = vmatpush3.msra.mxu0 %v1579_v2 }
 0x3fe   :  { %1418 = vmatprep.subr.mxu0 %v1520_v1 }
 0x3ff   :  { %1419 = vmatpush3.msra.mxu0 %v1591_v4  ;;  %v832_v4 = vld [vmem:[%s2101_s5 + $0x70] sm:$0xff] }
 0x400   :  { %1420 = vmatprep.subr.mxu0 %v1520_v1 }
 0x401   :  { %1421 = vmatpush3.msra.mxu0 %v1604_v7  ;;  %v828_v7 = vld [vmem:[%s2101_s5 + $0x50] sm:$0xff] }
 0x402   :  { %1422 = vmatprep.subr.mxu0 %v1520_v1 }
 0x403   :  { %1423 = vmatpush3.msra.mxu0 %v1613_v8  ;;  %v827_v8 = vld [vmem:[%s2101_s5 + $0x48] sm:$0xff] }
 0x404   :  { %1424 = vmatprep.subr.mxu0 %v1520_v1 }
 0x405   :  { %1425 = vmatpush3.msra.mxu0 %v1622_v9  ;;  %v826_v9 = vld [vmem:[%s2101_s5 + $0x40] sm:$0xff] }
 0x406   :  { %1426 = vmatprep.subr.mxu0 %v1520_v1 }
 0x407   :  { %1427 = vmatpush3.msra.mxu0 %v1631_v10  ;;  %v825_v10 = vld [vmem:[%s2101_s5 + $0x38] sm:$0xff] }
 0x408   :  { %1428 = vmatprep.subr.mxu0 %v1520_v1 }
 0x409   :  { %1429 = vmatpush3.msra.mxu0 %v1640_v11  ;;  %v824_v11 = vld [vmem:[%s2101_s5 + $0x30] sm:$0xff] }
 0x40a   :  { %1430 = vmatprep.subr.mxu0 %v1520_v1 }
 0x40b   :  { %1431 = vmatpush3.msra.mxu0 %v1649_v12  ;;  %v823_v12 = vld [vmem:[%s2101_s5 + $0x28] sm:$0xff] }
 0x40c   :  { %1432 = vmatprep.subr.mxu0 %v1520_v1 }
 0x40d   :  { %1433 = vmatpush3.msra.mxu0 %v1658_v13  ;;  %v822_v13 = vld [vmem:[%s2101_s5 + $0x20] sm:$0xff] }
 0x40e   :  { %1434 = vmatprep.subr.mxu0 %v1520_v1 }
 0x40f   :  { %1435 = vmatpush3.msra.mxu0 %v1667_v14  ;;  %v821_v14 = vld [vmem:[%s2101_s5 + $0x18] sm:$0xff] }
 0x410   :  { %1436 = vmatprep.subr.mxu0 %v1520_v1 }
 0x411   :  { %1437 = vmatpush3.msra.mxu0 %v1676_v15  ;;  %v820_v15 = vld [vmem:[%s2101_s5 + $0x10] sm:$0xff] }
 0x412   :  { %1438 = vmatprep.subr.mxu0 %v1520_v1 }
 0x413   :  { %1439 = vmatpush3.msra.mxu0 %v1685_v16  ;;  %v819_v16 = vld [vmem:[%s2101_s5 + $0x8] sm:$0xff] }
 0x414   :  { %1440 = vmatprep.subr.mxu0 %v1520_v1 }
 0x415   :  { %1441 = vmatpush3.msra.mxu0 %v1694_v17  ;;  %v818_v17 = vld [vmem:[%s2101_s5] sm:$0xff] }
 0x416   :  { %1442 = vmatprep.subr.mxu0 %v1520_v1 }
 0x417   :  { %1443 = vmatpush3.msra.mxu0 %v1703_v18  ;;  %v177_v18 = vadd.f32 %v1795_v28, %v1881_v45 }
 0x418   :  { %1444 = vmatprep.subr.mxu0 %v1520_v1  ;;  %v831_v1 = vld [vmem:[%s2101_s5 + $0x68] sm:$0xff] }
 0x419   :  { %1445 = vmatpush3.msra.mxu0 %v1712_v19 }
 0x4ba   :  { %v652_v63 = vpop.f32.mrf.mxu0 }
 0x4bb   :  { %v656_v0 = vadd.f32 %v652_v63, %v172_v62 }
 0x4bc   :  { %v1378_v2 = vpop.f32.mrf.mxu0 }
 0x4bd   :  { %v657_v3 = vmax.f32 %v656_v0, 0.0 }
 0x4bf   :  { %658 = vst [vmem:[#allocation3 + $0x28] sm:$0xff] %v657_v3  ;;  %1412 = vmatmul.mubr.f32.vlgmr.msra.gmra.mxu1 %v657_v3 }
 0x4c0   :  { %1450 = vmatpush3.msra.mxu1 %v833_v61  ;;  %1481 = vmatprep.mubr.f32.mxu1 %v1798_v34 }
 0x4c1   :  { %1451 = vmatprep.subr.mxu1 %v832_v4 }
 0x4c2   :  { %1452 = vmatpush3.msra.mxu1 %v832_v4 }
 0x4c3   :  { %1453 = vmatprep.subr.mxu1 %v831_v1 }
 0x4c4   :  { %1454 = vmatpush3.msra.mxu1 %v831_v1 }
 0x4c5   :  { %1455 = vmatprep.subr.mxu1 %v830_v5 }
 0x4c6   :  { %1456 = vmatpush3.msra.mxu1 %v830_v5 }
 0x4c7   :  { %1457 = vmatprep.subr.mxu1 %v829_v6 }
 0x4c8   :  { %1458 = vmatpush3.msra.mxu1 %v829_v6 }
 0x4c9   :  { %1459 = vmatprep.subr.mxu1 %v828_v7 }
 0x4ca   :  { %1460 = vmatpush3.msra.mxu1 %v828_v7 }
 0x4cb   :  { %1461 = vmatprep.subr.mxu1 %v827_v8 }
 0x4cc   :  { %1462 = vmatpush3.msra.mxu1 %v827_v8 }
 0x4cd   :  { %1463 = vmatprep.subr.mxu1 %v826_v9 }
 0x4ce   :  { %1464 = vmatpush3.msra.mxu1 %v826_v9 }
 0x4cf   :  { %1465 = vmatprep.subr.mxu1 %v825_v10 }
 0x4d0   :  { %1466 = vmatpush3.msra.mxu1 %v825_v10 }
 0x4d1   :  { %1467 = vmatprep.subr.mxu1 %v824_v11 }
 0x4d2   :  { %1468 = vmatpush3.msra.mxu1 %v824_v11 }
 0x4d3   :  { %1469 = vmatprep.subr.mxu1 %v823_v12 }
 0x4d4   :  { %1470 = vmatpush3.msra.mxu1 %v823_v12 }
 0x4d5   :  { %1471 = vmatprep.subr.mxu1 %v822_v13 }
 0x4d6   :  { %1472 = vmatpush3.msra.mxu1 %v822_v13 }
 0x4d7   :  { %1473 = vmatprep.subr.mxu1 %v821_v14 }
 0x4d8   :  { %1474 = vmatpush3.msra.mxu1 %v821_v14 }
 0x4d9   :  { %1475 = vmatprep.subr.mxu1 %v820_v15 }
 0x4da   :  { %1476 = vmatpush3.msra.mxu1 %v820_v15 }
 0x4db   :  { %1477 = vmatprep.subr.mxu1 %v819_v16 }
 0x4dc   :  { %1478 = vmatpush3.msra.mxu1 %v819_v16 }
 0x4dd   :  { %1479 = vmatprep.subr.mxu1 %v818_v17 }
 0x4de   :  { %1480 = vmatpush3.msra.mxu1 %v818_v17 }
 0x4df   :  { %1482 = vmatmul.mubr.f32.vlgmr.msra.gmra.mxu1 %v1837_v39 }
 0x4e0   :  { %1484 = vmatprep.mubr.f32.mxu1 %v1884_v50 }
 0x4e3   :  { %1485 = vmatmul.mubr.f32.gmra.mxu1 %v1923_v55 }
 0x4e4   :  { %1487 = vmatprep.mubr.f32.mxu1 %v1962_v60 }
 0x4e7   :  { %1488 = vmatmul.mubr.f32.gmra.mxu1 %v657_v3 }
 0x57f   :  { %v727_v19 = vpop.f32.mrf.mxu1 }
 0x580   :  { %v731_v20 = vadd.f32 %v727_v19, %v177_v18 }
 0x581   :  { %v1413_v21 = vpop.f32.mrf.mxu1 }
 0x582   :  { %v732_v22 = vmax.f32 %v731_v20, 0.0 }
 0x584   :  { %733 = vst [vmem:[#allocation3 + $0x30] sm:$0xff] %v732_v22  ;;  %1447 = vmatmul.mubr.f32.vlgmr.msra.gmra.mxu0 %v732_v22  ;;  %1490 = vmatprep.mubr.f32.mxu1 %v732_v22 }
 0x59f   :  { %v1483_v24 = vpop.f32.mrf.mxu1 }
 0x5a0   :  { %v913_v25 = vadd.f32 %v1483_v24, %v985_v23 }
 0x5a1   :  { %v907_v26 = vpop.f32.mrf.mxu1 }
 0x5a2   :  { %948 = vst.msk [vmem:[%s2103_s7 + $0x8] sm:$0xff] %vm946_vm3, %v913_v25  ;;  %v908_v27 = vadd.f32 %v985_v23, %v907_v26 }
 0x5a3   :  { %v1486_v29 = vpop.f32.mrf.mxu1 }
 0x5a4   :  { %947 = vst.msk [vmem:[%s2103_s7] sm:$0xff] %vm946_vm3, %v908_v27  ;;  %v923_v30 = vadd.f32 %v1486_v29, %v985_v23 }
 0x5a5   :  { %v917_v31 = vpop.f32.mrf.mxu1 }
 0x5a6   :  { %950 = vst.msk [vmem:[%s2103_s7 + $0x18] sm:$0xff] %vm946_vm3, %v923_v30  ;;  %v918_v32 = vadd.f32 %v985_v23, %v917_v31 }
 0x5a7   :  { %v1489_v33 = vpop.f32.mrf.mxu1 }
 0x5a8   :  { %949 = vst.msk [vmem:[%s2103_s7 + $0x10] sm:$0xff] %vm946_vm3, %v918_v32  ;;  %v933_v34 = vadd.f32 %v1489_v33, %v985_v23 }
 0x5a9   :  { %v927_v35 = vpop.f32.mrf.mxu1 }
 0x5aa   :  { %952 = vst.msk [vmem:[%s2103_s7 + $0x28] sm:$0xff] %vm946_vm3, %v933_v34  ;;  %v928_v36 = vadd.f32 %v985_v23, %v927_v35 }
 0x5ac   :  { %951 = vst.msk [vmem:[%s2103_s7 + $0x20] sm:$0xff] %vm946_vm3, %v928_v36 }
 0x644   :  { %v802_v38 = vpop.f32.mrf.mxu0 }
 0x645   :  { %v806_v39 = vadd.f32 %v802_v38, %v182_v37 }
 0x646   :  { %v1448_v40 = vpop.f32.mrf.mxu0 }
 0x647   :  { %v807_v41 = vmax.f32 %v806_v39, 0.0 }
 0x649   :  { %808 = vst [vmem:[#allocation3 + $0x38] sm:$0xff] %v807_v41  ;;  %1491 = vmatmul.mubr.f32.gmra.mxu1 %v807_v41 }
 0x64a   :  { %1509 = shalt.err (!%p1506_p4)
}
 0x64b   :  { %s1523_s26 = smov 128   ;;  %s1524_s27 = smov 8  }
 0x64c   :  { %968 = dma.vmem_to_hbm [thread:$0]  %s963_s24, 1024, %s2104_s8, [#allocation4], %s1523_s26, %s1523_s26, %s1524_s27  }
 0x709   :  { %v1492_v28 = vpop.f32.mrf.mxu1 }
 0x70a   :  { %v943_v42 = vadd.f32 %v1492_v28, %v985_v23 }
 0x70b   :  { %v937_v43 = vpop.f32.mrf.mxu1 }
 0x70c   :  { %954 = vst.msk [vmem:[%s2103_s7 + $0x38] sm:$0xff] %vm946_vm3, %v943_v42  ;;  %v938_v44 = vadd.f32 %v985_v23, %v937_v43 }
 0x70e   :  { %953 = vst.msk [vmem:[%s2103_s7 + $0x30] sm:$0xff] %vm946_vm3, %v938_v44 }
 0x70f   :  { %1518 = dma.done.wait [#allocation4], 1024  }
 0x710   :  { %1519 = vsyncadd [#allocation4], 4294966272 }
 0x711   :  { %974 = vsyncpa [#allocation4], 1 }

</bundles_post_ra>
